<compile_context>
chip_gen: v7x
topology: tpu7x:2x2x1
jax: 0.10.0
libtpu: 0.0.40
codegen_flags: <defaults>
</compile_context>

<pallas_src>
import functools

import jax
import jax.numpy as jnp
from jax import lax
from jax.experimental import pallas as pl
from jax.experimental.pallas import tpu as pltpu

_CHUNK = 256  # lanes per inner chunk (2 lane groups); keeps live vregs ~25-30


def _round_up(n, m):
    return ((n + m - 1) // m) * m


def _choose_tile(B, block_b, chunk, target_blocks=4):
    """Batch tile: multiple of `chunk`, capped at block_b, aiming for at least
    `target_blocks` grid steps (v7x megacore sharding + pipelining).  Never
    exceeds B, so blocks only clip at the ragged tail."""
    tb = _round_up(-(-B // target_blocks), chunk)
    return max(chunk, min(block_b, tb))


def _ikmlp_kernel(x_ref,
                  w1_ref, b1_ref,
                  w2_ref, b2_ref,
                  w3_ref, b3_ref,
                  w4_ref, b4_ref,
                  o_ref,
                  *, chunk, n_chunks, unroll):
    # Weights/biases are resident across the whole grid (constant index maps).
    w1 = w1_ref[...]   # (64, 3)
    w2 = w2_ref[...]   # (16, 64)
    w3 = w3_ref[...]   # (8, 16)
    w4 = w4_ref[...]   # (4, 8)

    # Hoist the bias lane-broadcasts out of the chunk loop (JAX does not CSE
    # broadcast_in_dim; re-emitting them per chunk is redundant VPU/XLU work).
    b1 = jnp.broadcast_to(b1_ref[...], (64, chunk))
    b2 = jnp.broadcast_to(b2_ref[...], (16, chunk))
    b3 = jnp.broadcast_to(b3_ref[...], (8, chunk))
    b4 = jnp.broadcast_to(b4_ref[...], (4, chunk))

    def chunk_body(off):
        xc = x_ref[:, pl.ds(off, chunk)]                      # (3, chunk)
        # All four layers on the MXU (tiny K = 3/64/16/8 is padded by Mosaic);
        # the VPU only does bias-add + ReLU, keeping the VALU slot light.
        h = jnp.dot(w1, xc, preferred_element_type=jnp.float32)
        h = jnp.maximum(h + b1, 0.0)                          # (64, chunk)
        h = jnp.dot(w2, h, preferred_element_type=jnp.float32)
        h = jnp.maximum(h + b2, 0.0)                          # (16, chunk)
        h = jnp.dot(w3, h, preferred_element_type=jnp.float32)
        h = jnp.maximum(h + b3, 0.0)                          # (8, chunk)
        y = jnp.dot(w4, h, preferred_element_type=jnp.float32) + b4
        o_ref[:, pl.ds(off, chunk)] = y.astype(o_ref.dtype)   # lane-dense store

    if unroll:
        # Fully unrolled chunk loop with static offsets (zero-cost slices);
        # lets the scheduler overlap MXU fill/drain across chunks.
        for c in range(n_chunks):
            chunk_body(c * chunk)
    else:
        # Rolled fallback: strictly bounded live ranges per iteration
        # (use if the bundle dump shows regalloc spills from the unrolled form).
        def body(c, carry):
            chunk_body(pl.multiple_of(c * chunk, chunk))
            return carry
        lax.fori_loop(0, n_chunks, body, None)


def ikmlp_forward_fm(x_fm, params, block_b=4096, chunk=_CHUNK, unroll=True):
    """Feature-major core: x_fm is (3, B) f32, returns (4, B) f32.
    Call this directly if the surrounding graph keeps activations
    feature-major (skips the two transpose HBM passes of ikmlp_forward)."""
    assert x_fm.ndim == 2 and x_fm.shape[0] == 3
    assert block_b % chunk == 0 and block_b >= chunk
    B = x_fm.shape[1]
    assert B >= 1

    if B < chunk:
        # Tiny batch: one full-array block (dims equal the array dims, so the
        # (8,128) rule is satisfied without padding or clipping).
        TB = B
        chunk_eff = B
        n_chunks = 1
    else:
        TB = _choose_tile(B, block_b, chunk)
        chunk_eff = chunk
        n_chunks = TB // chunk
    grid_b = pl.cdiv(B, TB)   # no padding: Pallas clips the ragged last block

    w1, b1 = params["w1"], params["b1"]   # (64, 3), (64, 1)
    w2, b2 = params["w2"], params["b2"]   # (16, 64), (16, 1)
    w3, b3 = params["w3"], params["b3"]   # (8, 16),  (8, 1)
    w4, b4 = params["w4"], params["b4"]   # (4, 8),   (4, 1)
    weight_args = (w1, b1, w2, b2, w3, b3, w4, b4)

    in_specs = [pl.BlockSpec((3, TB), lambda i: (0, i))]           # x: batch-tiled
    in_specs += [pl.BlockSpec(w.shape, lambda i: (0, 0))           # params: resident
                 for w in weight_args]
    out_spec = pl.BlockSpec((4, TB), lambda i: (0, i))

    n_weight_elems = 3 * 64 + 64 * 16 + 16 * 8 + 8 * 4 + 64 + 16 + 8 + 4
    cost = pl.CostEstimate(
        flops=2 * B * (3 * 64 + 64 * 16 + 16 * 8 + 8 * 4),
        transcendentals=0,
        bytes_accessed=4 * (B * 3 + B * 4 + n_weight_elems),
    )

    kernel = functools.partial(_ikmlp_kernel, chunk=chunk_eff,
                               n_chunks=n_chunks, unroll=unroll)

    return pl.pallas_call(
        kernel,
        out_shape=jax.ShapeDtypeStruct((4, B), jnp.float32),
        grid=(grid_b,),
        in_specs=in_specs,
        out_specs=out_spec,
        compiler_params=pltpu.CompilerParams(
            dimension_semantics=("parallel",)),
        cost_estimate=cost,
    )(x_fm, *weight_args)


def ikmlp_forward(x, params, block_b=4096, chunk=_CHUNK, unroll=True):
    """PyTorch-interface wrapper: x (B, 3) -> (B, 4).
    The x.T / out.T passes are pure layout plumbing; keep the surrounding
    graph feature-major and call ikmlp_forward_fm to avoid them."""
    out_fm = ikmlp_forward_fm(x.T, params, block_b=block_b, chunk=chunk,
                              unroll=unroll)
    return out_fm.T


def init_ikmlp_params(key):
    """PyTorch nn.Linear-style init: W (out, in), b (out, 1), both
    uniform(-1/sqrt(fan_in), 1/sqrt(fan_in))."""
    sizes = [(3, 64), (64, 16), (16, 8), (8, 4)]
    params = {}
    for i, (fin, fout) in enumerate(sizes, start=1):
        key, kw, kb = jax.random.split(key, 3)
        bound = 1.0 / jnp.sqrt(jnp.float32(fin))
        params[f"w{i}"] = jax.random.uniform(
            kw, (fout, fin), jnp.float32, minval=-bound, maxval=bound)
        params[f"b{i}"] = jax.random.uniform(
            kb, (fout, 1), jnp.float32, minval=-bound, maxval=bound)
    return params


def ikmlp_reference(x, params):
    """Pure-JAX reference matching PyTorch semantics: y = x @ W.T + b."""
    h = jnp.maximum(x @ params["w1"].T + params["b1"].T, 0.0)
    h = jnp.maximum(h @ params["w2"].T + params["b2"].T, 0.0)
    h = jnp.maximum(h @ params["w3"].T + params["b3"].T, 0.0)
    return h @ params["w4"].T + params["b4"].T


if __name__ == "__main__":
    key = jax.random.PRNGKey(0)
    key, kp = jax.random.split(key)
    params = init_ikmlp_params(kp)

    # B = 8    : tiny batch, single full-array block (no clipping anywhere)
    # B = 512  : TB = 256, two exact grid steps
    # B = 3000 : TB = 768 (3 chunks per step), 4 grid steps, ragged last block
    for B in (8, 512, 3000):
        key, kx = jax.random.split(key)
        x = jax.random.normal(kx, (B, 3), jnp.float32)

        out = jax.block_until_ready(ikmlp_forward(x, params))
        ref = ikmlp_reference(x, params)

        assert out.shape == (B, 4), out.shape
        err = float(jnp.max(jnp.abs(out - ref)))
        assert jnp.allclose(out, ref, atol=1e-5, rtol=1e-5), (
            f"B={B}: max abs err {err}")

    print("KERNEL_OK")
</pallas_src>

<mosaic_0001>
module attributes {stable_mosaic.version = 11 : i64} {
  func.func @_ikmlp_kernel(%arg0: i32, %arg1: memref<3x8xf32, #tpu.memory_space<vmem>>, %arg2: memref<64x3xf32, #tpu.memory_space<vmem>>, %arg3: memref<64x1xf32, #tpu.memory_space<vmem>>, %arg4: memref<16x64xf32, #tpu.memory_space<vmem>>, %arg5: memref<16x1xf32, #tpu.memory_space<vmem>>, %arg6: memref<8x16xf32, #tpu.memory_space<vmem>>, %arg7: memref<8x1xf32, #tpu.memory_space<vmem>>, %arg8: memref<4x8xf32, #tpu.memory_space<vmem>>, %arg9: memref<4x1xf32, #tpu.memory_space<vmem>>, %arg10: memref<4x8xf32, #tpu.memory_space<vmem>>) attributes {dimension_semantics = [#tpu.dimension_semantics<parallel>], iteration_bounds = array<i64: 1>, scalar_prefetch = 0 : i64, scratch_operands = 0 : i64, tpu.core_type = #tpu.core_type<tc>, window_params = [{transform_indices = @transform_0, window_bounds = array<i64: 3, 8>}, {pipeline_mode = #tpu.pipeline_mode<synchronous>, transform_indices = @transform_1, window_bounds = array<i64: 64, 3>}, {pipeline_mode = #tpu.pipeline_mode<synchronous>, transform_indices = @transform_2, window_bounds = array<i64: 64, 1>}, {pipeline_mode = #tpu.pipeline_mode<synchronous>, transform_indices = @transform_3, window_bounds = array<i64: 16, 64>}, {pipeline_mode = #tpu.pipeline_mode<synchronous>, transform_indices = @transform_4, window_bounds = array<i64: 16, 1>}, {pipeline_mode = #tpu.pipeline_mode<synchronous>, transform_indices = @transform_5, window_bounds = array<i64: 8, 16>}, {pipeline_mode = #tpu.pipeline_mode<synchronous>, transform_indices = @transform_6, window_bounds = array<i64: 8, 1>}, {pipeline_mode = #tpu.pipeline_mode<synchronous>, transform_indices = @transform_7, window_bounds = array<i64: 4, 8>}, {pipeline_mode = #tpu.pipeline_mode<synchronous>, transform_indices = @transform_8, window_bounds = array<i64: 4, 1>}, {transform_indices = @transform_9, window_bounds = array<i64: 4, 8>}]} {
    %c0 = arith.constant 0 : index
    %c0_0 = arith.constant 0 : index
    %0 = vector.load %arg2[%c0, %c0_0] : memref<64x3xf32, #tpu.memory_space<vmem>>, vector<64x3xf32>
    %c0_1 = arith.constant 0 : index
    %c0_2 = arith.constant 0 : index
    %1 = vector.load %arg4[%c0_1, %c0_2] : memref<16x64xf32, #tpu.memory_space<vmem>>, vector<16x64xf32>
    %c0_3 = arith.constant 0 : index
    %c0_4 = arith.constant 0 : index
    %2 = vector.load %arg6[%c0_3, %c0_4] : memref<8x16xf32, #tpu.memory_space<vmem>>, vector<8x16xf32>
    %c0_5 = arith.constant 0 : index
    %c0_6 = arith.constant 0 : index
    %3 = vector.load %arg8[%c0_5, %c0_6] : memref<4x8xf32, #tpu.memory_space<vmem>>, vector<4x8xf32>
    %c0_7 = arith.constant 0 : index
    %c0_8 = arith.constant 0 : index
    %4 = vector.load %arg3[%c0_7, %c0_8] : memref<64x1xf32, #tpu.memory_space<vmem>>, vector<64x1xf32>
    %5 = vector.shape_cast %4 : vector<64x1xf32> to vector<64x1xf32>
    %6 = vector.broadcast %5 : vector<64x1xf32> to vector<64x8xf32>
    %c0_9 = arith.constant 0 : index
    %c0_10 = arith.constant 0 : index
    %7 = vector.load %arg5[%c0_9, %c0_10] : memref<16x1xf32, #tpu.memory_space<vmem>>, vector<16x1xf32>
    %8 = vector.shape_cast %7 : vector<16x1xf32> to vector<16x1xf32>
    %9 = vector.broadcast %8 : vector<16x1xf32> to vector<16x8xf32>
    %c0_11 = arith.constant 0 : index
    %c0_12 = arith.constant 0 : index
    %10 = vector.load %arg7[%c0_11, %c0_12] : memref<8x1xf32, #tpu.memory_space<vmem>>, vector<8x1xf32>
    %11 = vector.shape_cast %10 : vector<8x1xf32> to vector<8x1xf32>
    %12 = vector.broadcast %11 : vector<8x1xf32> to vector<8x8xf32>
    %c0_13 = arith.constant 0 : index
    %c0_14 = arith.constant 0 : index
    %13 = vector.load %arg9[%c0_13, %c0_14] : memref<4x1xf32, #tpu.memory_space<vmem>>, vector<4x1xf32>
    %14 = vector.shape_cast %13 : vector<4x1xf32> to vector<4x1xf32>
    %15 = vector.broadcast %14 : vector<4x1xf32> to vector<4x8xf32>
    %c0_15 = arith.constant 0 : index
    %c0_16 = arith.constant 0 : index
    %16 = vector.load %arg1[%c0_15, %c0_16] : memref<3x8xf32, #tpu.memory_space<vmem>>, vector<3x8xf32>
    %cst = arith.constant dense<0.000000e+00> : vector<64x8xf32>
    %17 = tpu.matmul %0, %16, %cst {dimension_numbers = #tpu.dot_dimension_numbers<[1], [0], [0], [1], [0, 0, 1, 1], [], []>} : vector<64x3xf32>, vector<3x8xf32>, vector<64x8xf32> -> vector<64x8xf32>
    %18 = arith.addf %17, %6 : vector<64x8xf32>
    %cst_17 = arith.constant 0.000000e+00 : f32
    %19 = vector.broadcast %cst_17 : f32 to vector<64x8xf32>
    %20 = arith.maximumf %18, %19 : vector<64x8xf32>
    %cst_18 = arith.constant dense<0.000000e+00> : vector<16x8xf32>
    %21 = tpu.matmul %1, %20, %cst_18 {dimension_numbers = #tpu.dot_dimension_numbers<[1], [0], [0], [1], [0, 0, 1, 1], [], []>} : vector<16x64xf32>, vector<64x8xf32>, vector<16x8xf32> -> vector<16x8xf32>
    %22 = arith.addf %21, %9 : vector<16x8xf32>
    %cst_19 = arith.constant 0.000000e+00 : f32
    %23 = vector.broadcast %cst_19 : f32 to vector<16x8xf32>
    %24 = arith.maximumf %22, %23 : vector<16x8xf32>
    %cst_20 = arith.constant dense<0.000000e+00> : vector<8x8xf32>
    %25 = tpu.matmul %2, %24, %cst_20 {dimension_numbers = #tpu.dot_dimension_numbers<[1], [0], [0], [1], [0, 0, 1, 1], [], []>} : vector<8x16xf32>, vector<16x8xf32>, vector<8x8xf32> -> vector<8x8xf32>
    %26 = arith.addf %25, %12 : vector<8x8xf32>
    %cst_21 = arith.constant 0.000000e+00 : f32
    %27 = vector.broadcast %cst_21 : f32 to vector<8x8xf32>
    %28 = arith.maximumf %26, %27 : vector<8x8xf32>
    %cst_22 = arith.constant dense<0.000000e+00> : vector<4x8xf32>
    %29 = tpu.matmul %3, %28, %cst_22 {dimension_numbers = #tpu.dot_dimension_numbers<[1], [0], [0], [1], [0, 0, 1, 1], [], []>} : vector<4x8xf32>, vector<8x8xf32>, vector<4x8xf32> -> vector<4x8xf32>
    %30 = arith.addf %29, %15 : vector<4x8xf32>
    %c0_23 = arith.constant 0 : index
    %c0_24 = arith.constant 0 : index
    %31 = vector.load %arg10[%c0_23, %c0_24] : memref<4x8xf32, #tpu.memory_space<vmem>>, vector<4x8xf32>
    tpu.vector_store %arg10[%c0_23, %c0_24], %30 {strides = array<i32>} : memref<4x8xf32, #tpu.memory_space<vmem>>, vector<4x8xf32>,
    return
  }
  func.func @transform_0(%arg0: i32) -> (i32, i32) {
    %c0_i32 = arith.constant 0 : i32
    %c0_i32_0 = arith.constant 0 : i32
    return %c0_i32, %arg0 : i32, i32
  }
  func.func @transform_1(%arg0: i32) -> (i32, i32) {
    %c0_i32 = arith.constant 0 : i32
    %c0_i32_0 = arith.constant 0 : i32
    %c0_i32_1 = arith.constant 0 : i32
    return %c0_i32, %c0_i32_0 : i32, i32
  }
  func.func @transform_2(%arg0: i32) -> (i32, i32) {
    %c0_i32 = arith.constant 0 : i32
    %c0_i32_0 = arith.constant 0 : i32
    %c0_i32_1 = arith.constant 0 : i32
    return %c0_i32, %c0_i32_0 : i32, i32
  }
  func.func @transform_3(%arg0: i32) -> (i32, i32) {
    %c0_i32 = arith.constant 0 : i32
    %c0_i32_0 = arith.constant 0 : i32
    %c0_i32_1 = arith.constant 0 : i32
    return %c0_i32, %c0_i32_0 : i32, i32
  }
  func.func @transform_4(%arg0: i32) -> (i32, i32) {
    %c0_i32 = arith.constant 0 : i32
    %c0_i32_0 = arith.constant 0 : i32
    %c0_i32_1 = arith.constant 0 : i32
    return %c0_i32, %c0_i32_0 : i32, i32
  }
  func.func @transform_5(%arg0: i32) -> (i32, i32) {
    %c0_i32 = arith.constant 0 : i32
    %c0_i32_0 = arith.constant 0 : i32
    %c0_i32_1 = arith.constant 0 : i32
    return %c0_i32, %c0_i32_0 : i32, i32
  }
  func.func @transform_6(%arg0: i32) -> (i32, i32) {
    %c0_i32 = arith.constant 0 : i32
    %c0_i32_0 = arith.constant 0 : i32
    %c0_i32_1 = arith.constant 0 : i32
    return %c0_i32, %c0_i32_0 : i32, i32
  }
  func.func @transform_7(%arg0: i32) -> (i32, i32) {
    %c0_i32 = arith.constant 0 : i32
    %c0_i32_0 = arith.constant 0 : i32
    %c0_i32_1 = arith.constant 0 : i32
    return %c0_i32, %c0_i32_0 : i32, i32
  }
  func.func @transform_8(%arg0: i32) -> (i32, i32) {
    %c0_i32 = arith.constant 0 : i32
    %c0_i32_0 = arith.constant 0 : i32
    %c0_i32_1 = arith.constant 0 : i32
    return %c0_i32, %c0_i32_0 : i32, i32
  }
  func.func @transform_9(%arg0: i32) -> (i32, i32) {
    %c0_i32 = arith.constant 0 : i32
    %c0_i32_0 = arith.constant 0 : i32
    return %c0_i32, %arg0 : i32, i32
  }
}

</mosaic_0001>

<bundles_post_ra>
// kernel: tpu_custom_call.1
= control target key start
LH: loop header
LB: loop body
LE: loop exit
PB: predicated region body
PF: predicated region fallthrough
CT: control target
= control target key end

     0   :  { %vm143_vm0 = vcmask 1042432   ;;  %vm118_vm1 = vcmask 23552   ;;  %v641_v4 = vmov 0   ;;  %s793_s0 = inlined_call_operand.vmem [shape: f32[3,8], index: 0, kind: input, shape index: {}]   ;;  %s794_s1 = inlined_call_operand.vmem [shape: f32[64,3], index: 1, kind: input, shape index: {}]   ;;  %s795_s2 = inlined_call_operand.vmem [shape: f32[64,1], index: 2, kind: input, shape index: {}]   ;;  %s796_s3 = inlined_call_operand.vmem [shape: f32[16,64], index: 3, kind: input, shape index: {}]   ;;  %s797_s4 = inlined_call_operand.vmem [shape: f32[16,1], index: 4, kind: input, shape index: {}]   ;;  %s798_s5 = inlined_call_operand.vmem [shape: f32[8,16], index: 5, kind: input, shape index: {}]   ;;  %s799_s6 = inlined_call_operand.vmem [shape: f32[8,1], index: 6, kind: input, shape index: {}]   ;;  %s800_s7 = inlined_call_operand.vmem [shape: f32[4,8], index: 7, kind: input, shape index: {}]   ;;  %s801_s8 = inlined_call_operand.vmem [shape: f32[4,1], index: 8, kind: input, shape index: {}]   ;;  %s802_s9 = inlined_call_operand.hbm [shape: f32[4,8], index: 9, kind: output, shape index: {}]  }
   0x1   :  { %v117_v0 = vld [vmem:[%s793_s0] sm:$0x7]  ;;  %v34_v2 = vld [vmem:[%s794_s1 + $0x8] sm:$0xff]  ;;  %v35_v3 = vld [vmem:[%s794_s1 + $0x10] sm:$0xff]  ;;  %615 = vset.pattern.permute.xlu0 %v641_v4  ;;  %616 = vset.pattern.permute.xlu1 %v641_v4 }
   0x2   :  { %v33_v1 = vld [vmem:[%s794_s1] sm:$0xff]  ;;  %546 = vmatprep.subr.msk.mxu0 %vm143_vm0, %v117_v0  ;;  %v47_v6 = vld [vmem:[%s795_s2 + $0x10] sm:$0xff]  ;;  %v36_v7 = vld [vmem:[%s794_s1 + $0x18] sm:$0xff] }
   0x3   :  { %548 = vmatprep.mubr.msk.f32.mxu0 %vm118_vm1, %v33_v1  ;;  %547 = vmatpush3.msk.msra.mxu0 %vm143_vm0, %v117_v0  ;;  %v45_v5 = vld [vmem:[%s795_s2] sm:$0xff]  ;;  %v46_v9 = vld [vmem:[%s795_s2 + $0x8] sm:$0xff]  ;;  %v48_v10 = vld [vmem:[%s795_s2 + $0x18] sm:$0xff] }
   0x4   :  { %549 = vmatmul.mubr.msk.f32.vlgmr.msra.gmra.mrb[0].mxu0 %vm118_vm1, %v34_v2  ;;  %55 = vperm.xlu0 %615, %v45_v5   ;;  %v37_v8 = vld [vmem:[%s794_s1 + $0x20] sm:$0xff] }
   0x5   :  { %551 = vmatprep.mubr.msk.f32.mxu0 %vm118_vm1, %v35_v3  ;;  %65 = vperm.xlu1 %616, %v47_v6  }
   0x8   :  { %552 = vmatmul.mubr.msk.f32.gmra.mrb[2].mxu0 %vm118_vm1, %v36_v7 }
   0x9   :  { %14 = vsyncpa [#allocation3], 0  ;;  %554 = vmatprep.mubr.msk.f32.mxu0 %vm118_vm1, %v37_v8  ;;  %v38_v11 = vld [vmem:[%s794_s1 + $0x28] sm:$0xff]  ;;  %60 = vperm.xlu0 %615, %v46_v9   ;;  %v39_v12 = vld [vmem:[%s794_s1 + $0x30] sm:$0xff]  ;;  %vm260_vm2 = vcmask 523264   ;;  %v642_v60 = vmov 0.0|0.0  }
   0xa   :  { %70 = vperm.xlu1 %616, %v48_v10   ;;  %v49_v13 = vld [vmem:[%s795_s2 + $0x20] sm:$0xff]  ;;  %v50_v14 = vld [vmem:[%s795_s2 + $0x28] sm:$0xff]  ;;  %v40_v15 = vld [vmem:[%s794_s1 + $0x38] sm:$0xff]  ;;  %607 = vmatprep.subr.bf16.mxu0 %v642_v60  ;;  %vm643_vm3 = vmmov 0   ;;  %v644_v61 = vmov 0.0   ;;  %vm344_vm4 = vcmask 130048  }
   0xb   :  { %v51_v16 = vld [vmem:[%s795_s2 + $0x30] sm:$0xff]  ;;  %v52_v17 = vld [vmem:[%s795_s2 + $0x38] sm:$0xff]  ;;  %v93_v18 = vld [vmem:[%s797_s4] sm:$0xff]  ;;  %vm419_vm5 = vcmask 64512   ;;  %s645_s30 = smov [#allocation2]   ;;  %vm493_vm6 = vcmask 60416  }
   0xc   :  { %555 = vmatmul.mubr.msk.f32.gmra.mrb[4].mxu0 %vm118_vm1, %v38_v11  ;;  %v94_v19 = vld [vmem:[%s797_s4 + $0x8] sm:$0xff]  ;;  %v105_v20 = vld [vmem:[%s799_s6] sm:$0xff]  ;;  %s501_s10 = sshll.u32 %s645_s30, 4  ;;  %s502_s10 = int_to_ptr.vmem [resolvable:$true] %s501_s10 }
   0xd   :  { %557 = vmatprep.mubr.msk.f32.mxu0 %vm118_vm1, %v39_v12  ;;  %75 = vperm.xlu0 %615, %v49_v13   ;;  %v111_v21 = vld [vmem:[%s801_s8] sm:$0xf]  ;;  %v42_v59 = vld [vmem:[%s796_s3 + $0x8] sm:$0xff]  ;;  %p622_p1 = scmp.lt.s32.totalorder %s502_s10, %s502_s10 }
   0xe   :  { %80 = vperm.xlu1 %616, %v50_v14   ;;  %v41_v22 = vld [vmem:[%s796_s3] sm:$0xff] }
   0xf   :  { %576 = vmatprep.mubr.msk.f32.mxu1 %vm260_vm2, %v41_v22  ;;  %v43_v7 = vld [vmem:[%s798_s5] sm:$0xff]  ;;  %s617_s5 = scalar_lea.vmem %s502_s10, 64 }
  0x10   :  { %558 = vmatmul.mubr.msk.f32.gmra.mrb[6].mxu0 %vm118_vm1, %v40_v15  ;;  %v44_v13 = vld [vmem:[%s800_s7] sm:$0xf]  ;;  %p618_p0 = scmp.ne.s32.totalorder %s502_s10, %s617_s5  ;;  %p623_p2 = scmp.lt.s32.totalorder %s617_s5, %s617_s5 }
  0x11   :  { %85 = vperm.xlu0 %615, %v51_v16   ;;  %583 = vmatprep.mubr.msk.f32.mxu0 %vm643_vm3, %v644_v61 }
  0x12   :  { %90 = vperm.xlu1 %616, %v52_v17   ;;  %p624_p3 = por %p623_p2, %p622_p1 }
  0x14   :  { %p625_p4 = pnand %p624_p3, %p618_p0 }
  0x15   :  { %97 = vperm.xlu0 %615, %v93_v18  }
  0x16   :  { %102 = vperm.xlu1 %616, %v94_v19  }
  0x19   :  { %108 = vperm.xlu0 %615, %v105_v20  }
  0x1a   :  { %114 = vperm.xlu1 %616, %v111_v21  }
  0x83   :  { %v56_v23 = vpop.permute.xlu0 %55 }
  0x84   :  { %v66_v24 = vpop.permute.xlu1 %65 }
  0x88   :  { %v61_v25 = vpop.permute.xlu0 %60 }
  0x89   :  { %v71_v26 = vpop.permute.xlu1 %70 }
  0x8c   :  { %v76_v39 = vpop.permute.xlu0 %75 }
  0x8d   :  { %v81_v36 = vpop.permute.xlu1 %80 }
  0x90   :  { %v86_v51 = vpop.permute.xlu0 %85 }
  0x91   :  { %v91_v48 = vpop.permute.xlu1 %90 }
  0x94   :  { %v98_v0 = vpop.permute.xlu0 %97 }
  0x95   :  { %v103_v62 = vpop.permute.xlu1 %102 }
  0x98   :  { %v109_v8 = vpop.permute.xlu0 %108 }
  0x99   :  { %v115_v14 = vpop.permute.xlu1 %114 }
  0xd7   :  { %v550_v27 = vpop.f32.mrb[0].mxu0 }
  0xd8   :  { %v219_v28 = vadd.f32 %v550_v27, %v61_v25  ;;  %v213_v29 = vpop.f32.mrb[1].mxu0 }
  0xd9   :  { %v214_v30 = vadd.f32 %v213_v29, %v56_v23 }
  0xda   :  { %v253_v31 = vmax.f32 %v219_v28, 0.0 }
  0xdb   :  { %v252_v32 = vmax.f32 %v214_v30, 0.0  ;;  %v553_v33 = vpop.f32.mrb[2].mxu0 }
  0xdc   :  { %v229_v34 = vadd.f32 %v553_v33, %v71_v26  ;;  %v223_v35 = vpop.f32.mrb[3].mxu0 }
  0xdd   :  { %v224_v37 = vadd.f32 %v223_v35, %v66_v24  ;;  %v591_v38 = vpack.c.bf16 %v253_v31, %v252_v32 }
  0xde   :  { %v255_v40 = vmax.f32 %v229_v34, 0.0 }
  0xdf   :  { %v254_v41 = vmax.f32 %v224_v37, 0.0  ;;  %v556_v42 = vpop.f32.mrb[4].mxu0  ;;  %592 = vmatprep.subr.bf16.mxu1 %v591_v38 }
  0xe0   :  { %v239_v43 = vadd.f32 %v556_v42, %v81_v36  ;;  %v233_v44 = vpop.f32.mrb[5].mxu0  ;;  %594 = vmatpush3.bf16.msra.mxu1 %v591_v38 }
  0xe1   :  { %v595_v45 = vpack.c.bf16 %v255_v40, %v254_v41  ;;  %v234_v46 = vadd.f32 %v233_v44, %v76_v39 }
  0xe2   :  { %v257_v47 = vmax.f32 %v239_v43, 0.0 }
  0xe3   :  { %v256_v49 = vmax.f32 %v234_v46, 0.0  ;;  %v559_v50 = vpop.f32.mrb[6].mxu0  ;;  %596 = vmatprep.subr.bf16.mxu1 %v595_v45 }
  0xe4   :  { %v249_v52 = vadd.f32 %v559_v50, %v91_v48  ;;  %v243_v53 = vpop.f32.mrb[7].mxu0  ;;  %598 = vmatpush3.bf16.msra.mxu1 %v595_v45 }
  0xe5   :  { %v599_v54 = vpack.c.bf16 %v257_v47, %v256_v49  ;;  %v244_v55 = vadd.f32 %v243_v53, %v86_v51 }
  0xe6   :  { %v259_v56 = vmax.f32 %v249_v52, 0.0 }
  0xe7   :  { %v258_v57 = vmax.f32 %v244_v55, 0.0  ;;  %600 = vmatprep.subr.bf16.mxu1 %v599_v54 }
  0xe8   :  { %602 = vmatpush3.bf16.msra.mxu1 %v599_v54 }
  0xe9   :  { %v603_v58 = vpack.c.bf16 %v259_v56, %v258_v57 }
  0xeb   :  { %604 = vmatprep.subr.bf16.mxu1 %v603_v58 }
  0xec   :  { %606 = vmatpush3.bf16.msra.mxu1 %v603_v58 }
  0xed   :  { %586 = vmatprep.subr.mxu1 %v644_v61 }
  0xef   :  { %577 = vmatmul.mubr.msk.f32.vlgmr.msra.gmra.mrb[0].mxu1 %vm260_vm2, %v42_v59 }
  0xf0   :  { %588 = vmatprep.mubr.msk.f32.mxu1 %vm643_vm3, %v644_v61 }
 0x1c2   :  { %v578_v63 = vpop.f32.mrb[0].mxu1 }
 0x1c3   :  { %v339_v1 = vadd.f32 %v578_v63, %v103_v62  ;;  %v333_v2 = vpop.f32.mrb[1].mxu1 }
 0x1c4   :  { %v334_v3 = vadd.f32 %v333_v2, %v98_v0 }
 0x1c5   :  { %v343_v4 = vmax.f32 %v339_v1, 0.0 }
 0x1c6   :  { %v342_v5 = vmax.f32 %v334_v3, 0.0 }
 0x1c8   :  { %v608_v6 = vpack.c.bf16 %v343_v4, %v342_v5 }
 0x1ca   :  { %609 = vmatpush3.bf16.msra.mxu0 %v608_v6 }
 0x1cd   :  { %584 = vmatmul.mubr.msk.f32.vlgmr.msra.gmra.mrb[8].mxu0 %vm344_vm4, %v43_v7 }
 0x2a0   :  { %v414_v9 = vpop.f32.mrb[8].mxu0 }
 0x2a1   :  { %v415_v10 = vadd.f32 %v414_v9, %v109_v8  ;;  %v585_v11 = vpop.f32.mrb[9].mxu0 }
 0x2a3   :  { %v418_v12 = vmax.f32 %v415_v10, 0.0 }
 0x2a5   :  { %587 = vmatpush3.msra.mxu1 %v418_v12 }
 0x2a6   :  { %589 = vmatmul.mubr.msk.f32.vlgmr.msra.gmra.mrb[2].mxu1 %vm419_vm5, %v44_v13 }
 0x379   :  { %v489_v15 = vpop.f32.mrb[2].mxu1 }
 0x37a   :  { %v490_v16 = vadd.f32 %v489_v15, %v115_v14  ;;  %v590_v17 = vpop.f32.mrb[3].mxu1 }
 0x37c   :  { %494 = vst.msk [vmem:[#allocation2] sm:$0xf] %vm493_vm6, %v490_v16 }
 0x37d   :  { %628 = shalt.err (!%p625_p4)
}
 0x37e   :  { %s629_s12 = scalar_lea.hbm %s802_s9, 64 }
 0x37f   :  { %p630_p5 = scmp.ne.s32.totalorder %s802_s9, %s629_s12  ;;  %p633_p6 = scmp.lt.u32.totalorder %s629_s12, %s802_s9 }
 0x381   :  { %p635_p7 = pnand %p633_p6, %p630_p5 }
 0x383   :  { %638 = shalt.err (!%p635_p7)
}
 0x384   :  { %504 = dma.vmem_to_hbm [thread:$0]  %s502_s10, 64, %s802_s9, [#allocation3]  }
 0x385   :  { %639 = dma.done.wait [#allocation3], 64  }
 0x386   :  { %640 = vsyncadd [#allocation3], 4294967232 }
 0x387   :  { %508 = vsyncpa [#allocation3], 1 }

</bundles_post_ra>
